<compile_context>
chip_gen: v6e
topology: v6e:2x2x1
jax: 0.10.0
libtpu: 0.0.40
codegen_flags: <defaults>
</compile_context>

<pallas_src>
import functools
import math

import jax
import jax.numpy as jnp
from jax import lax
from jax.experimental import pallas as pl
from jax.experimental.pallas import tpu as pltpu

# Scoped-VMEM ceiling: <= ~48 MiB so the same kernel is safe on v7x (64 MiB
# physical) while still comfortably holding the 512-class dense tiles that
# v5e/v6e (128 MiB) want.  Actual usage is ~10 MiB.
_VMEM_LIMIT = 48 * 1024 * 1024


def _pick_tile(dim, target, multiple):
    """Largest tile <= target that divides `dim` and is a multiple of `multiple`.

    Falls back to the full extent (single block) for small / awkward dims.
    # TODO(synk): replace the full-extent fallback with pl.cdiv grids + edge
    # masking so huge non-divisible dims never become one giant block.
    """
    cand = (min(target, dim) // multiple) * multiple
    while cand >= multiple:
        if dim % cand == 0:
            return cand
        cand -= multiple
    return dim


# ----------------------------------------------------------------------------
# Kernel 1: tiled dense projection  out = x @ W + b   (x, W already bf16)
# ----------------------------------------------------------------------------
def _dense_kernel(x_ref, w_ref, b_ref, o_ref, acc_ref):
    k = pl.program_id(2)

    @pl.when(k == 0)
    def _():
        acc_ref[...] = jnp.zeros(acc_ref.shape, acc_ref.dtype)

    # Operands arrive as bf16 (cast once at the JAX level) -> no in-kernel cast,
    # half the DMA bytes, half the double-buffered VMEM.
    acc_ref[...] += jnp.dot(x_ref[...], w_ref[...],
                            preferred_element_type=jnp.float32)

    @pl.when(k == pl.num_programs(2) - 1)
    def _():
        o_ref[...] = (acc_ref[...] + b_ref[...]).astype(o_ref.dtype)


def dense(x2d, w, b, *, out_dtype=jnp.float32,
          tm_target=512, tn_target=512, tk_target=1024):
    """x2d: [M, K] bf16, w: [K, N] bf16, b: [1, N] f32 -> [M, N] (tiled)."""
    M, K = x2d.shape
    N = w.shape[1]
    tm = _pick_tile(M, tm_target, 128)
    tn = _pick_tile(N, tn_target, 128)
    tk = _pick_tile(K, tk_target, 128)

    return pl.pallas_call(
        _dense_kernel,
        out_shape=jax.ShapeDtypeStruct((M, N), out_dtype),
        grid_spec=pltpu.PrefetchScalarGridSpec(
            num_scalar_prefetch=0,
            grid=(M // tm, N // tn, K // tk),
            in_specs=[
                pl.BlockSpec((tm, tk), lambda i, j, k: (i, k)),
                pl.BlockSpec((tk, tn), lambda i, j, k: (k, j)),
                pl.BlockSpec((1, tn), lambda i, j, k: (0, j)),
            ],
            out_specs=pl.BlockSpec((tm, tn), lambda i, j, k: (i, j)),
            scratch_shapes=[pltpu.VMEM((tm, tn), jnp.float32)],
        ),
        compiler_params=pltpu.CompilerParams(
            dimension_semantics=("parallel", "parallel", "arbitrary"),
            vmem_limit_bytes=_VMEM_LIMIT,
        ),
    )(x2d, w, b)


# ----------------------------------------------------------------------------
# Kernel 2: flash-style causal attention over a TRIANGULAR flattened grid
# ----------------------------------------------------------------------------
def _attn_step_tables(T):
    """Flatten the lower-triangular (qi, ki) pairs into one grid axis."""
    qi_list, ki_list = [], []
    for q in range(T):
        for k in range(q + 1):          # ki = 0 .. qi  (diagonal block last)
            qi_list.append(q)
            ki_list.append(k)
    return (jnp.asarray(qi_list, dtype=jnp.int32),
            jnp.asarray(ki_list, dtype=jnp.int32))


def _flash_attn_kernel(qi_map_ref, ki_map_ref, q_ref, k_ref, v_ref, o_ref,
                       q_sc, m_sc, l_sc, acc_sc, *, scale):
    step = pl.program_id(1)
    qi = qi_map_ref[step]
    ki = ki_map_ref[step]

    @pl.when(ki == 0)
    def _init():
        # New q block: pre-scale + cast once, reused for every kv block.
        q_sc[...] = (q_ref[...].astype(jnp.float32) * scale).astype(jnp.bfloat16)
        m_sc[...] = jnp.full(m_sc.shape, -jnp.inf, m_sc.dtype)
        l_sc[...] = jnp.zeros(l_sc.shape, l_sc.dtype)
        acc_sc[...] = jnp.zeros(acc_sc.shape, acc_sc.dtype)

    def scores():
        # Contract last dims directly (no explicit transpose / XLU traffic).
        return lax.dot_general(q_sc[...], k_ref[...], (((1,), (1,)), ((), ())),
                               preferred_element_type=jnp.float32)  # [tq, tkv]

    def update(s):
        m_prev = m_sc[...]
        m_new = jnp.maximum(m_prev, jnp.max(s, axis=-1, keepdims=True))
        alpha = jnp.exp(m_prev - m_new)
        p = jnp.exp(s - m_new)
        l_sc[...] = alpha * l_sc[...] + jnp.sum(p, axis=-1, keepdims=True)
        acc_sc[...] = alpha * acc_sc[...] + jnp.dot(
            p.astype(jnp.bfloat16), v_ref[...], preferred_element_type=jnp.float32)
        m_sc[...] = m_new

    # Off-diagonal blocks: fully below the causal diagonal -> no mask work.
    @pl.when(ki < qi)
    def _off_diag():
        update(scores())

    # Diagonal block: apply the (local) triangular mask, then finalize.
    @pl.when(ki == qi)
    def _diag_and_finalize():
        s = scores()
        tq, tkv = s.shape
        row = lax.broadcasted_iota(jnp.int32, (tq, tkv), 0)
        col = lax.broadcasted_iota(jnp.int32, (tq, tkv), 1)
        update(jnp.where(col <= row, s, -jnp.inf))   # exact: tq == tkv, ki == qi
        # Deferred normalization: one EUP approx reciprocal per output row.
        o_ref[...] = (acc_sc[...] *
                      pl.reciprocal(l_sc[...], approx=True)).astype(o_ref.dtype)


def _attn_scratch(tq, hd):
    return [
        pltpu.VMEM((tq, hd), jnp.bfloat16),   # pre-scaled q
        pltpu.VMEM((tq, 1), jnp.float32),     # running max
        pltpu.VMEM((tq, 1), jnp.float32),     # running denominator
        pltpu.VMEM((tq, hd), jnp.float32),    # output accumulator
    ]


def causal_attention(q, k, v, *, out_dtype=jnp.bfloat16, tq_target=256):
    """Fallback path. q, k, v: [B*H, N, hd] bf16 -> [B*H, N, hd] causal attn."""
    BH, N, hd = q.shape
    tq = _pick_tile(N, tq_target, 16)   # 16-multiple keeps bf16 sublane tiling legal
    tkv = tq                            # equal tiles -> diagonal block handles the mask
    T = N // tq
    qi_map, ki_map = _attn_step_tables(T)
    n_steps = int(qi_map.shape[0])      # T*(T+1)/2 -- upper triangle never scheduled

    kernel = functools.partial(_flash_attn_kernel, scale=1.0 / math.sqrt(hd))

    return pl.pallas_call(
        kernel,
        out_shape=jax.ShapeDtypeStruct((BH, N, hd), out_dtype),
        grid_spec=pltpu.PrefetchScalarGridSpec(
            num_scalar_prefetch=2,
            grid=(BH, n_steps),
            in_specs=[
                pl.BlockSpec((None, tq, hd),
                             lambda bh, s, qi_m, ki_m: (bh, qi_m[s], 0)),
                pl.BlockSpec((None, tkv, hd),
                             lambda bh, s, qi_m, ki_m: (bh, ki_m[s], 0)),
                pl.BlockSpec((None, tkv, hd),
                             lambda bh, s, qi_m, ki_m: (bh, ki_m[s], 0)),
            ],
            out_specs=pl.BlockSpec((None, tq, hd),
                                   lambda bh, s, qi_m, ki_m: (bh, qi_m[s], 0)),
            scratch_shapes=_attn_scratch(tq, hd),
        ),
        compiler_params=pltpu.CompilerParams(
            dimension_semantics=("parallel", "arbitrary"),
            vmem_limit_bytes=_VMEM_LIMIT,
        ),
    )(qi_map, ki_map, q, k, v)


def causal_attention_fused(qkv2d, B, N, H, hd, *, out_dtype=jnp.bfloat16,
                           tq_target=256):
    """Transpose-free path (hd % 128 == 0 and N % 128 == 0).

    Reads q/k/v directly out of the 2-D qkv activation [B*N, 3*D] (column
    layout [q heads | k heads | v heads]) and writes the attention output
    directly into the [B*N, D] layout consumed by the output projection.
    """
    D = H * hd
    tq = _pick_tile(N, tq_target, 128)
    tkv = tq
    T = N // tq
    NB = N // tq                         # row blocks per batch element
    qi_map, ki_map = _attn_step_tables(T)
    n_steps = int(qi_map.shape[0])

    def q_idx(bh, s, qi_m, ki_m):
        return ((bh // H) * NB + qi_m[s], bh % H)

    def k_idx(bh, s, qi_m, ki_m):
        return ((bh // H) * NB + ki_m[s], H + bh % H)

    def v_idx(bh, s, qi_m, ki_m):
        return ((bh // H) * NB + ki_m[s], 2 * H + bh % H)

    def o_idx(bh, s, qi_m, ki_m):
        return ((bh // H) * NB + qi_m[s], bh % H)

    kernel = functools.partial(_flash_attn_kernel, scale=1.0 / math.sqrt(hd))

    return pl.pallas_call(
        kernel,
        out_shape=jax.ShapeDtypeStruct((B * N, D), out_dtype),
        grid_spec=pltpu.PrefetchScalarGridSpec(
            num_scalar_prefetch=2,
            grid=(B * H, n_steps),
            in_specs=[
                pl.BlockSpec((tq, hd), q_idx),
                pl.BlockSpec((tkv, hd), k_idx),
                pl.BlockSpec((tkv, hd), v_idx),
            ],
            out_specs=pl.BlockSpec((tq, hd), o_idx),
            scratch_shapes=_attn_scratch(tq, hd),
        ),
        compiler_params=pltpu.CompilerParams(
            dimension_semantics=("parallel", "arbitrary"),
            vmem_limit_bytes=_VMEM_LIMIT,
        ),
    )(qi_map, ki_map, qkv2d, qkv2d, qkv2d)


# ----------------------------------------------------------------------------
# Full module forward
# ----------------------------------------------------------------------------
def causal_self_attention(x, params, num_heads):
    """x: [B, N, D] float32 -> [B, N, D] float32."""
    B, N, D = x.shape
    H = num_heads
    hd = D // H

    # bf16 operands for all MXU work (f32 accumulate inside the kernels).
    # In production the weights would simply be stored as bf16.
    x2d = x.reshape(B * N, D).astype(jnp.bfloat16)
    w_qkv = params["w_qkv"].astype(jnp.bfloat16)
    w_o = params["w_o"].astype(jnp.bfloat16)

    # QKV projection; bf16 inter-stage activations halve HBM traffic.
    qkv = dense(x2d, w_qkv, params["b_qkv"], out_dtype=jnp.bfloat16)  # [B*N, 3D]

    if hd % 128 == 0 and N % 128 == 0:
        # Lane-legal head geometry: fold the layout into the BlockSpec index
        # maps -> no wrapper transposes (saves two full HBM round trips).
        attn2d = causal_attention_fused(qkv, B, N, H, hd, out_dtype=jnp.bfloat16)
    else:
        # TODO(synk): hd < 128 under-fills the 128-lane vregs / masked stores;
        # prefer a head geometry with hd >= 128 in production.
        qkv5 = qkv.reshape(B, N, 3, H, hd)
        qkv5 = jnp.transpose(qkv5, (2, 0, 3, 1, 4))          # [3, B, H, N, hd]
        q = qkv5[0].reshape(B * H, N, hd)
        k = qkv5[1].reshape(B * H, N, hd)
        v = qkv5[2].reshape(B * H, N, hd)
        attn = causal_attention(q, k, v, out_dtype=jnp.bfloat16)  # [B*H, N, hd]
        attn2d = jnp.transpose(attn.reshape(B, H, N, hd),
                               (0, 2, 1, 3)).reshape(B * N, D)

    out = dense(attn2d, w_o, params["b_o"], out_dtype=jnp.float32)
    # TODO(synk): nn.Dropout / attn_dropout are identity at inference; omitted.
    return out.reshape(B, N, D)


# ----------------------------------------------------------------------------
# Pure-JAX f32 reference (for a sanity check)
# ----------------------------------------------------------------------------
def reference(x, params, num_heads):
    B, N, D = x.shape
    hd = D // num_heads
    qkv = x @ params["w_qkv"] + params["b_qkv"][0]
    qkv = qkv.reshape(B, N, 3, num_heads, hd).transpose(2, 0, 3, 1, 4)
    q, k, v = qkv[0], qkv[1], qkv[2]
    s = jnp.einsum("bhqd,bhkd->bhqk", q, k) / math.sqrt(hd)
    mask = jnp.tril(jnp.ones((N, N), dtype=bool))
    s = jnp.where(mask, s, -jnp.inf)
    p = jax.nn.softmax(s, axis=-1)
    a = jnp.einsum("bhqk,bhkd->bhqd", p, v)
    a = a.transpose(0, 2, 1, 3).reshape(B, N, D)
    return a @ params["w_o"] + params["b_o"][0]


# ----------------------------------------------------------------------------
if __name__ == "__main__":
    B, N, D = 2, 16, 32
    num_heads = 4

    key = jax.random.PRNGKey(0)
    k_x, k_wqkv, k_bqkv, k_wo, k_bo = jax.random.split(key, 5)

    x = jax.random.normal(k_x, (B, N, D), dtype=jnp.float32)

    # Deterministic parameter init (PyTorch stores W_qkv as [3D, D], W_o as
    # [D, D]); kept pre-transposed here for x @ W layouts.
    scale = 1.0 / math.sqrt(D)
    params = {
        "w_qkv": jax.random.uniform(k_wqkv, (D, 3 * D), jnp.float32, -scale, scale),
        "b_qkv": jax.random.uniform(k_bqkv, (1, 3 * D), jnp.float32, -scale, scale),
        "w_o":   jax.random.uniform(k_wo,   (D, D),     jnp.float32, -scale, scale),
        "b_o":   jax.random.uniform(k_bo,   (1, D),     jnp.float32, -scale, scale),
    }

    out = causal_self_attention(x, params, num_heads)
    out = jax.block_until_ready(out)

    ref = reference(x, params, num_heads)
    assert out.shape == (B, N, D)
    # bf16 MXU operands + bf16 inter-stage activations -> loosened tolerance.
    assert jnp.allclose(out, ref, atol=2e-2, rtol=2e-2), (
        "mismatch vs reference; max abs err = %f"
        % float(jnp.max(jnp.abs(out - ref))))

    print("KERNEL_OK")
</pallas_src>

<mosaic_0001>
module attributes {stable_mosaic.version = 11 : i64} {
  func.func @_dense_kernel(%arg0: i32, %arg1: i32, %arg2: i32, %arg3: memref<32x32xbf16, #tpu.memory_space<vmem>>, %arg4: memref<32x96xbf16, #tpu.memory_space<vmem>>, %arg5: memref<1x96xf32, #tpu.memory_space<vmem>>, %arg6: memref<32x96xbf16, #tpu.memory_space<vmem>>, %arg7: memref<32x96xf32, #tpu.memory_space<vmem>>) attributes {dimension_semantics = [#tpu.dimension_semantics<parallel>, #tpu.dimension_semantics<parallel>, #tpu.dimension_semantics<arbitrary>], iteration_bounds = array<i64: 1, 1, 1>, scalar_prefetch = 0 : i64, scratch_operands = 1 : i64, tpu.core_type = #tpu.core_type<tc>, window_params = [{transform_indices = @transform_0, window_bounds = array<i64: 32, 32>}, {transform_indices = @transform_1, window_bounds = array<i64: 32, 96>}, {transform_indices = @transform_2, window_bounds = array<i64: 1, 96>}, {transform_indices = @transform_3, window_bounds = array<i64: 32, 96>}]} {
    %c0_i32 = arith.constant 0 : i32
    %0 = arith.cmpi eq, %arg2, %c0_i32 : i32
    %1 = arith.extui %0 : i1 to i32
    %c0_i32_0 = arith.constant 0 : i32
    %2 = arith.cmpi ne, %1, %c0_i32_0 : i32
    scf.if %2 {
      %cst_10 = arith.constant 0.000000e+00 : f32
      %12 = vector.broadcast %cst_10 : f32 to vector<32x96xf32>
      %c0_11 = arith.constant 0 : index
      %c0_12 = arith.constant 0 : index
      %13 = vector.load %arg7[%c0_11, %c0_12] : memref<32x96xf32, #tpu.memory_space<vmem>>, vector<32x96xf32>
      tpu.vector_store %arg7[%c0_11, %c0_12], %12 {strides = array<i32>} : memref<32x96xf32, #tpu.memory_space<vmem>>, vector<32x96xf32>,
    } else {
    }
    %c0 = arith.constant 0 : index
    %c0_1 = arith.constant 0 : index
    %3 = vector.load %arg7[%c0, %c0_1] : memref<32x96xf32, #tpu.memory_space<vmem>>, vector<32x96xf32>
    %c0_2 = arith.constant 0 : index
    %c0_3 = arith.constant 0 : index
    %4 = vector.load %arg3[%c0_2, %c0_3] : memref<32x32xbf16, #tpu.memory_space<vmem>>, vector<32x32xbf16>
    %c0_4 = arith.constant 0 : index
    %c0_5 = arith.constant 0 : index
    %5 = vector.load %arg4[%c0_4, %c0_5] : memref<32x96xbf16, #tpu.memory_space<vmem>>, vector<32x96xbf16>
    %cst = arith.constant dense<0.000000e+00> : vector<32x96xf32>
    %6 = tpu.matmul %4, %5, %cst {dimension_numbers = #tpu.dot_dimension_numbers<[1], [0], [0], [1], [0, 0, 1, 1], [], []>} : vector<32x32xbf16>, vector<32x96xbf16>, vector<32x96xf32> -> vector<32x96xf32>
    %7 = arith.addf %3, %6 : vector<32x96xf32>
    %c0_6 = arith.constant 0 : index
    %c0_7 = arith.constant 0 : index
    %8 = vector.load %arg7[%c0_6, %c0_7] : memref<32x96xf32, #tpu.memory_space<vmem>>, vector<32x96xf32>
    tpu.vector_store %arg7[%c0_6, %c0_7], %7 {strides = array<i32>} : memref<32x96xf32, #tpu.memory_space<vmem>>, vector<32x96xf32>,
    %c0_i32_8 = arith.constant 0 : i32
    %9 = arith.cmpi eq, %arg2, %c0_i32_8 : i32
    %10 = arith.extui %9 : i1 to i32
    %c0_i32_9 = arith.constant 0 : i32
    %11 = arith.cmpi ne, %10, %c0_i32_9 : i32
    scf.if %11 {
      %c0_10 = arith.constant 0 : index
      %c0_11 = arith.constant 0 : index
      %12 = vector.load %arg7[%c0_10, %c0_11] : memref<32x96xf32, #tpu.memory_space<vmem>>, vector<32x96xf32>
      %c0_12 = arith.constant 0 : index
      %c0_13 = arith.constant 0 : index
      %13 = vector.load %arg5[%c0_12, %c0_13] : memref<1x96xf32, #tpu.memory_space<vmem>>, vector<1x96xf32>
      %14 = vector.broadcast %13 : vector<1x96xf32> to vector<32x96xf32>
      %15 = arith.addf %12, %14 : vector<32x96xf32>
      %16 = arith.truncf %15 : vector<32x96xf32> to vector<32x96xbf16>
      %c0_14 = arith.constant 0 : index
      %c0_15 = arith.constant 0 : index
      %17 = vector.load %arg6[%c0_14, %c0_15] : memref<32x96xbf16, #tpu.memory_space<vmem>>, vector<32x96xbf16>
      tpu.vector_store %arg6[%c0_14, %c0_15], %16 {strides = array<i32>} : memref<32x96xbf16, #tpu.memory_space<vmem>>, vector<32x96xbf16>,
    } else {
    }
    return
  }
  func.func @transform_0(%arg0: i32, %arg1: i32, %arg2: i32) -> (i32, i32) {
    %c0_i32 = arith.constant 0 : i32
    return %arg0, %arg2 : i32, i32
  }
  func.func @transform_1(%arg0: i32, %arg1: i32, %arg2: i32) -> (i32, i32) {
    %c0_i32 = arith.constant 0 : i32
    return %arg2, %arg1 : i32, i32
  }
  func.func @transform_2(%arg0: i32, %arg1: i32, %arg2: i32) -> (i32, i32) {
    %c0_i32 = arith.constant 0 : i32
    %c0_i32_0 = arith.constant 0 : i32
    return %c0_i32, %arg1 : i32, i32
  }
  func.func @transform_3(%arg0: i32, %arg1: i32, %arg2: i32) -> (i32, i32) {
    %c0_i32 = arith.constant 0 : i32
    return %arg0, %arg1 : i32, i32
  }
}

</mosaic_0001>

<bundles_post_ra>
// kernel: tpu_custom_call.1
= control target key start
LH: loop header
LB: loop body
LE: loop exit
PB: predicated region body
PF: predicated region fallthrough
CT: control target
= control target key end

     0   :  { %8 = vsyncpa [#allocation4], 0  ;;  %s371_s0 = inlined_call_operand.hbm [shape: bf16[32,32], index: 0, kind: input, shape index: {}]   ;;  %s372_s1 = inlined_call_operand.hbm [shape: bf16[32,96], index: 1, kind: input, shape index: {}]   ;;  %s373_s2 = inlined_call_operand.vmem [shape: f32[1,96], index: 2, kind: input, shape index: {}]   ;;  %s374_s3 = inlined_call_operand.hbm [shape: bf16[32,96], index: 3, kind: output, shape index: {}]  }
   0x1   :  { %9 = vsyncpa [#allocation7], 0 }
   0x2   :  { %10 = vsyncpa [#allocation5], 0  ;;  %s312_s12 = smov [#allocation3]  }
   0x3   :  { %s16_s13 = sshll.u32 %s312_s12, 4  ;;  %s17_s13 = int_to_ptr.vmem [resolvable:$true] %s16_s13 }
   0x4   :  { %s254_s14 = scalar_lea.vmem %s17_s13, 256  ;;  %p259_p1 = scmp.lt.s32.totalorder %s17_s13, %s17_s13 }
   0x5   :  { %p255_p0 = scmp.ne.s32.totalorder %s17_s13, %s254_s14  ;;  %p260_p2 = scmp.lt.s32.totalorder %s254_s14, %s254_s14 }
   0x7   :  { %p261_p3 = por %p260_p2, %p259_p1 }
   0x9   :  { %p262_p4 = pnand %p261_p3, %p255_p0 }
   0xb   :  { %265 = shalt.err (!%p262_p4)
}
   0xc   :  { %s313_s15 = smov 64   ;;  %s314_s16 = smov 4  }
   0xd   :  { %22 = dma.hbm_to_vmem [thread:$0]  %s371_s0, 256, %s17_s13, [#allocation4], %s313_s15, %s313_s15, %s314_s16  }
   0xe   :  { %s315_s19 = smov [#allocation6]  }
   0xf   :  { %s28_s20 = sshll.u32 %s315_s19, 4  ;;  %s29_s20 = int_to_ptr.vmem [resolvable:$true] %s28_s20 }
  0x10   :  { %s274_s21 = scalar_lea.vmem %s29_s20, 256  ;;  %p279_p6 = scmp.lt.s32.totalorder %s29_s20, %s29_s20 }
  0x11   :  { %p275_p5 = scmp.ne.s32.totalorder %s29_s20, %s274_s21  ;;  %p280_p7 = scmp.lt.s32.totalorder %s274_s21, %s274_s21 }
  0x13   :  { %p281_p8 = por %p280_p7, %p279_p6 }
  0x15   :  { %p282_p9 = pnand %p281_p8, %p275_p5 }
  0x17   :  { %285 = shalt.err (!%p282_p9)
}
  0x18   :  { %34 = dma.hbm_to_vmem [thread:$0]  %s372_s1, 256, %s29_s20, [#allocation7], %s313_s15, %s313_s15, %s314_s16  }
  0x19   :  { %306 = dma.done.wait [#allocation4], 256  }
  0x1a   :  { %307 = vsyncadd [#allocation4], 4294967040 }
  0x1b   :  { %308 = dma.done.wait [#allocation7], 256  }
  0x1c   :  { %309 = vsyncadd [#allocation7], 4294967040  ;;  %vm48_vm0 = vcmask 785408   ;;  %v316_v0 = vmov 0.0   ;;  %v242_v1 = vld [vmem:[#allocation6 + $0x8] sm:$0xff]   ;;  %v243_v2 = vld [vmem:[#allocation6] sm:$0xff]  }
  0x1d   :  { %51 = vst.msk [vmem:[#allocation2 + $0x10] sm:$0xff] %vm48_vm0, %v316_v0  ;;  %49 = vst.msk [vmem:[#allocation2] sm:$0xff] %vm48_vm0, %v316_v0  ;;  %vm87_vm1 = vcmask 261120   ;;  %228 = vmatprep.subr.bf16.mxu0 %v242_v1  ;;  %v244_v3 = vld [vmem:[#allocation3] sm:$0xff]   ;;  %v245_v4 = vld [vmem:[#allocation3 + $0x8] sm:$0xff]   ;;  %vm186_vm2 = vcmask 781312  }
  0x1e   :  { %50 = vst.msk [vmem:[#allocation2 + $0x8] sm:$0xff] %vm48_vm0, %v316_v0  ;;  %52 = vst.msk [vmem:[#allocation2 + $0x18] sm:$0xff] %vm48_vm0, %v316_v0  ;;  %229 = vmatpush3.bf16.msra.mxu0 %v242_v1  ;;  %232 = vmatprep.mubr.msk.bf16.mxu0 %vm87_vm1, %v244_v3  ;;  %v215_v17 = vld [vmem:[%s373_s2] ss:$0 sm:$0xff]  ;;  %s317_s24 = smov [#allocation8]  }
  0x1f   :  { %230 = vmatprep.subr.bf16.mxu0 %v243_v2  ;;  %s196_s25 = sshll.u32 %s317_s24, 4  ;;  %s197_s25 = int_to_ptr.vmem [resolvable:$true] %s196_s25 }
  0x20   :  { %s286_s2 = scalar_lea.vmem %s197_s25, 256  ;;  %p291_p11 = scmp.lt.s32.totalorder %s197_s25, %s197_s25 }
  0x21   :  { %p287_p10 = scmp.ne.s32.totalorder %s197_s25, %s286_s2  ;;  %p292_p12 = scmp.lt.s32.totalorder %s286_s2, %s286_s2 }
  0x22   :  { %231 = vmatpush3.bf16.msra.mxu0 %v243_v2 }
  0x23   :  { %p293_p13 = por %p292_p12, %p291_p11 }
  0x24   :  { %v55_v5 = vld [vmem:[#allocation2 + $0x10] sm:$0xff]  ;;  %v53_v7 = vld [vmem:[#allocation2] sm:$0xff] }
  0x25   :  { %233 = vmatmul.mubr.msk.bf16.vlgmr.msra.gmra.mxu0 %vm87_vm1, %v245_v4  ;;  %v56_v10 = vld [vmem:[#allocation2 + $0x18] sm:$0xff]  ;;  %v54_v13 = vld [vmem:[#allocation2 + $0x8] sm:$0xff]  ;;  %p294_p0 = pnand %p293_p13, %p287_p10 }
  0xe5   :  { %v234_v6 = vpop.f32.mrf.mxu0 }
  0xe6   :  { %v145_v8 = vadd.f32 %v234_v6, %v55_v5 }
  0xe7   :  { %v128_v9 = vpop.f32.mrf.mxu0 }
  0xe8   :  { %150 = vst.msk [vmem:[#allocation2 + $0x10] sm:$0xff] %vm48_vm0, %v145_v8  ;;  %v143_v11 = vadd.f32 %v128_v9, %v53_v7 }
  0xe9   :  { %v235_v12 = vpop.f32.mrf.mxu0 }
  0xea   :  { %148 = vst.msk [vmem:[#allocation2] sm:$0xff] %vm48_vm0, %v143_v11  ;;  %v146_v14 = vadd.f32 %v235_v12, %v56_v10 }
  0xeb   :  { %v131_v15 = vpop.f32.mrf.mxu0 }
  0xec   :  { %151 = vst.msk [vmem:[#allocation2 + $0x18] sm:$0xff] %vm48_vm0, %v146_v14  ;;  %v144_v16 = vadd.f32 %v131_v15, %v54_v13 }
  0xee   :  { %149 = vst.msk [vmem:[#allocation2 + $0x8] sm:$0xff] %vm48_vm0, %v144_v16 }
  0xef   :  { %v157_v18 = vld [vmem:[#allocation2 + $0x10] sm:$0xff] }
  0xf0   :  { %v168_v19 = vadd.f32 %v215_v17, %v157_v18 }
  0xf1   :  { %v155_v20 = vld [vmem:[#allocation2] sm:$0xff] }
  0xf2   :  { %v166_v21 = vadd.f32 %v215_v17, %v155_v20  ;;  %v222_v22 = vpack.c.bf16 %v168_v19, %v168_v19 }
  0xf3   :  { %v158_v23 = vld [vmem:[#allocation2 + $0x18] sm:$0xff] }
  0xf4   :  { %v169_v24 = vadd.f32 %v215_v17, %v158_v23  ;;  %v220_v25 = vpack.c.bf16 %v166_v21, %v166_v21  ;;  %189 = vst.msk [vmem:[#allocation8 + $0x8] sm:$0xf] %vm186_vm2, %v222_v22 }
  0xf5   :  { %v156_v26 = vld [vmem:[#allocation2 + $0x8] sm:$0xff] }
  0xf6   :  { %v167_v27 = vadd.f32 %v215_v17, %v156_v26  ;;  %v223_v28 = vpack.c.bf16 %v169_v24, %v169_v24  ;;  %187 = vst.msk [vmem:[#allocation8] sm:$0xf] %vm186_vm2, %v220_v25 }
  0xf8   :  { %v221_v29 = vpack.c.bf16 %v167_v27, %v167_v27  ;;  %190 = vst.msk [vmem:[#allocation8 + $0xc] sm:$0xf] %vm186_vm2, %v223_v28 }
  0xfa   :  { %188 = vst.msk [vmem:[#allocation8 + $0x4] sm:$0xf] %vm186_vm2, %v221_v29 }
  0xfb   :  { %297 = shalt.err (!%p294_p0)
}
  0xfc   :  { %202 = dma.vmem_to_hbm [thread:$0]  %s197_s25, 256, %s374_s3, [#allocation5], %s313_s15, %s313_s15, %s314_s16  }
  0xfd   :  { %310 = dma.done.wait [#allocation5], 256  }
  0xfe   :  { %311 = vsyncadd [#allocation5], 4294967040 }
  0xff   :  { %206 = vsyncpa [#allocation4], 1 }
 0x100   :  { %207 = vsyncpa [#allocation7], 1 }
 0x101   :  { %208 = vsyncpa [#allocation5], 1 }

</bundles_post_ra>
